<compile_context>
chip_gen: v7x
topology: tpu7x:2x2x1
jax: 0.10.0
libtpu: 0.0.40
codegen_flags: <defaults>
</compile_context>

<pallas_src>
import math

import jax
import jax.numpy as jnp
from jax import lax
from jax.experimental import pallas as pl
from jax.experimental.pallas import tpu as pltpu


def node_importance_kernel(scalars_ref, v_ref, root_ref, close_ref, deg_ref,
                           adjT_ref, out_ref, acc_ref):
    # scalars_ref (SMEM, (5,)): [w_closeness, w_degree, w_score, bias, gnn_bias]
    k = pl.program_id(1)

    @pl.when(k == 0)
    def _():
        acc_ref[...] = jnp.zeros_like(acc_ref)

    # agg_tile[i] += sum_j v[j] * adjT[j, i]   (bf16 x bf16 -> f32 on the MXU)
    acc_ref[...] += lax.dot_general(
        v_ref[...], adjT_ref[...],
        dimension_numbers=(((1,), (0,)), ((), ())),
        preferred_element_type=jnp.float32)                      # [1, TILE_M]

    @pl.when(k == pl.num_programs(1) - 1)
    def _():
        w_c = scalars_ref[0]
        w_d = scalars_ref[1]
        w_s = scalars_ref[2]
        bias = scalars_ref[3]
        gnn_b = scalars_ref[4]
        score = jnp.maximum(root_ref[...] + acc_ref[...] + gnn_b, 0.0)  # relu(GraphConv)
        out_ref[...] = jnp.maximum(score * w_s
                                   + close_ref[...] * w_c
                                   + deg_ref[...] * w_d
                                   + bias, 0.0)                  # relu(centrality-adjusted)


def node_importance_score(scalars, v_row, root_row, close_row, deg_row, adjT,
                          *, tile_m, tile_k):
    Np = adjT.shape[0]
    n_tiles = Np // tile_m
    n_k = Np // tile_k

    # Roofline bookkeeping: kernel is HBM-bound on the adjT stream (~1 flop/B).
    flops = int(2 * Np * Np + 10 * Np)
    bytes_accessed = int(Np * Np * 2             # adjT bf16 stream
                         + n_tiles * Np * 2      # v re-read per row tile
                         + 4 * Np * 4            # root/close/deg in, score out
                         )
    # Real per-buffer VMEM accounting (double-buffered pipeline blocks + scratch).
    vmem_need = (2 * (tile_k * tile_m * 2)       # adjT bf16 block x2
                 + 2 * (tile_k * 2)              # v bf16 block x2
                 + 2 * 3 * (tile_m * 4)          # root/close/deg f32 blocks x2
                 + 2 * (tile_m * 4)              # output block x2
                 + tile_m * 4                    # f32 accumulator scratch
                 + (2 << 20))                    # headroom
    try:
        vmem_cap = int(pltpu.get_tpu_info().vmem_capacity_bytes)
    except Exception:  # pragma: no cover - conservative fallback
        vmem_cap = 64 * 1024 * 1024
    vmem_limit = int(min(max(vmem_need, 32 * 1024 * 1024),
                         vmem_cap - 16 * 1024 * 1024))

    return pl.pallas_call(
        node_importance_kernel,
        out_shape=jax.ShapeDtypeStruct((1, Np), jnp.float32),
        grid=(n_tiles, n_k),
        in_specs=[
            pl.BlockSpec(memory_space=pltpu.MemorySpace.SMEM),         # scalars (5,)
            pl.BlockSpec((1, tile_k), lambda i, k: (0, k)),            # v     [1, TK] bf16
            pl.BlockSpec((1, tile_m), lambda i, k: (0, i)),            # root  [1, TM]
            pl.BlockSpec((1, tile_m), lambda i, k: (0, i)),            # close [1, TM]
            pl.BlockSpec((1, tile_m), lambda i, k: (0, i)),            # deg   [1, TM]
            pl.BlockSpec((tile_k, tile_m), lambda i, k: (k, i)),       # adjT  [TK, TM] bf16
        ],
        out_specs=pl.BlockSpec((1, tile_m), lambda i, k: (0, i)),      # score [1, TM]
        scratch_shapes=[pltpu.VMEM((1, tile_m), jnp.float32)],
        compiler_params=pltpu.CompilerParams(
            dimension_semantics=("parallel", "arbitrary"),
            vmem_limit_bytes=vmem_limit),
        cost_estimate=pl.CostEstimate(flops=flops, transcendentals=0,
                                      bytes_accessed=bytes_accessed),
    )(scalars, v_row, root_row, close_row, deg_row, adjT)


def _round_up(v, m):
    return ((v + m - 1) // m) * m


def node_importance_forward(x, edge_index, closeness, degree, params, ratio=0.5,
                            batch=None):
    """Full NodeImportance forward (layer=1, gnn='GCN', bias=True), single graph."""
    N, F = x.shape
    if batch is None:
        batch = jnp.zeros((N,), dtype=jnp.int32)

    # Pad to >= 2 row tiles so the "parallel" axis can shard across both v7x TCs.
    Np = _round_up(max(N, 256), 256)
    tile_m = 128 if Np <= 512 else 256
    # K (contraction) tile: largest multiple of 256 dividing Np, capped at 2048
    # so the adjT block's VMEM footprint is bounded independently of graph size.
    if Np <= 2048:
        tile_k = Np
    else:
        tile_k = max(d for d in (2048, 1024, 512, 256) if Np % d == 0)

    # Transposed dense adjacency adjT[src, dst] = #edges src -> dst, built
    # DIRECTLY in bf16 (small integer counts are exact; no f32 intermediate).
    adjT = jnp.zeros((Np, Np), dtype=jnp.bfloat16).at[
        edge_index[0], edge_index[1]].add(1.0)

    # Hoisted projection: [2, F] @ [F, Np] -> [2, Np] (tiny XLA matmul).
    w = jnp.concatenate([params["w_root"].reshape(1, -1),
                         params["w_rel"].reshape(1, -1)],
                        axis=0).astype(jnp.float32)                  # [2, F]
    xT = jnp.zeros((F, Np), jnp.float32).at[:, :N].set(
        x.T.astype(jnp.float32))                                     # [F, Np]
    proj = jnp.dot(w, xT, preferred_element_type=jnp.float32)        # [2, Np]
    root_row = proj[0:1, :]                                          # [1, Np] f32
    v_row = proj[1:2, :].astype(jnp.bfloat16)                        # [1, Np] bf16

    close_row = jnp.zeros((1, Np), jnp.float32).at[0, :N].set(
        closeness.astype(jnp.float32))
    deg_row = jnp.zeros((1, Np), jnp.float32).at[0, :N].set(
        degree.astype(jnp.float32))
    scalars = jnp.stack([params["weight_closeness"], params["weight_degree"],
                         params["weight_score"], params["bias"],
                         params["gnn_bias"]]).astype(jnp.float32)

    score_row = node_importance_score(scalars, v_row, root_row, close_row,
                                      deg_row, adjT,
                                      tile_m=tile_m, tile_k=tile_k)
    score = score_row[0, :N]        # padded-node scores are sliced off here

    # TODO(synk): per-graph topk + gather done in plain JAX (no clean Pallas sort
    # on TPU); tie-ordering may differ from torch_geometric's topk.
    k = int(math.ceil(ratio * N))
    _, perm = jax.lax.top_k(score, k)
    x_out = x[perm] * score[perm][:, None]
    batch_out = batch[perm]
    return x_out, perm, batch_out, score


def _reference_score(x, adj, params, closeness, degree):
    h = x @ params["w_root"] + (adj @ x) @ params["w_rel"] + params["gnn_bias"]
    s = jnp.maximum(h.reshape(-1), 0.0)
    cent = (closeness * params["weight_closeness"]
            + degree * params["weight_degree"] + params["bias"])
    return jnp.maximum(s * params["weight_score"] + cent, 0.0)


if __name__ == "__main__":
    N, F, E = 64, 32, 128            # nodes, in_channels, edges
    ratio = 0.5

    key = jax.random.PRNGKey(0)
    kx, ke, kc, kd, kw1, kw2, ksc = jax.random.split(key, 7)

    x = jax.random.normal(kx, (N, F), dtype=jnp.float32)
    edge_index = jax.random.randint(ke, (2, E), 0, N, dtype=jnp.int32)
    closeness = jax.random.uniform(kc, (N,), dtype=jnp.float32)
    degree = jax.random.uniform(kd, (N,), minval=0.0, maxval=4.0, dtype=jnp.float32)

    # Deterministic parameter init (shapes from __init__ with layer=1, gnn='GCN').
    bound = 1.0 / math.sqrt(F)
    sc = jax.random.uniform(ksc, (5,), dtype=jnp.float32)  # uniform_(a=0, b=1)
    params = {
        "w_root": jax.random.uniform(kw1, (F, 1), minval=-bound, maxval=bound,
                                     dtype=jnp.float32),
        "w_rel": jax.random.uniform(kw2, (F, 1), minval=-bound, maxval=bound,
                                    dtype=jnp.float32),
        "gnn_bias": sc[4],
        "weight_closeness": sc[0],
        "weight_degree": sc[1],
        "weight_score": sc[2],
        "bias": sc[3],
    }

    x_out, perm, batch_out, score = node_importance_forward(
        x, edge_index, closeness, degree, params, ratio=ratio)
    jax.block_until_ready((x_out, perm, batch_out, score))

    # Sanity check against a pure-JAX f32 reference (original, un-reassociated
    # form).  The kernel's neighbor vector v is bf16 (MXU-native operand), so
    # tolerances are loosened accordingly.
    adj = jnp.zeros((N, N), jnp.float32).at[edge_index[1], edge_index[0]].add(1.0)
    ref = _reference_score(x, adj, params, closeness, degree)
    assert jnp.allclose(score, ref, atol=1e-2, rtol=1e-2), "score mismatch"
    assert x_out.shape == (int(math.ceil(ratio * N)), F)

    print("KERNEL_OK")
</pallas_src>

<mosaic_0001>
module attributes {stable_mosaic.version = 11 : i64} {
  func.func @node_importance_kernel(%arg0: i32, %arg1: i32, %arg2: memref<5xf32, #tpu.memory_space<smem>>, %arg3: memref<1x256xbf16, #tpu.memory_space<vmem>>, %arg4: memref<1x128xf32, #tpu.memory_space<vmem>>, %arg5: memref<1x128xf32, #tpu.memory_space<vmem>>, %arg6: memref<1x128xf32, #tpu.memory_space<vmem>>, %arg7: memref<256x128xbf16, #tpu.memory_space<vmem>>, %arg8: memref<1x128xf32, #tpu.memory_space<vmem>>, %arg9: memref<1x128xf32, #tpu.memory_space<vmem>>) attributes {dimension_semantics = [#tpu.dimension_semantics<parallel>, #tpu.dimension_semantics<arbitrary>], iteration_bounds = array<i64: 2, 1>, scalar_prefetch = 0 : i64, scratch_operands = 1 : i64, tpu.core_type = #tpu.core_type<tc>, window_params = [{transform_indices = @transform_0, window_bounds = array<i64: 5>}, {transform_indices = @transform_1, window_bounds = array<i64: 1, 256>}, {transform_indices = @transform_2, window_bounds = array<i64: 1, 128>}, {transform_indices = @transform_3, window_bounds = array<i64: 1, 128>}, {transform_indices = @transform_4, window_bounds = array<i64: 1, 128>}, {transform_indices = @transform_5, window_bounds = array<i64: 256, 128>}, {transform_indices = @transform_6, window_bounds = array<i64: 1, 128>}]} {
    %c0_i32 = arith.constant 0 : i32
    %0 = arith.cmpi eq, %arg1, %c0_i32 : i32
    %1 = arith.extui %0 : i1 to i32
    %c0_i32_0 = arith.constant 0 : i32
    %2 = arith.cmpi ne, %1, %c0_i32_0 : i32
    scf.if %2 {
      %cst_10 = arith.constant 0.000000e+00 : f32
      %12 = vector.broadcast %cst_10 : f32 to vector<1x128xf32>
      %c0_11 = arith.constant 0 : index
      %c0_12 = arith.constant 0 : index
      %13 = vector.load %arg9[%c0_11, %c0_12] : memref<1x128xf32, #tpu.memory_space<vmem>>, vector<1x128xf32>
      tpu.vector_store %arg9[%c0_11, %c0_12], %12 {strides = array<i32>} : memref<1x128xf32, #tpu.memory_space<vmem>>, vector<1x128xf32>,
    } else {
    }
    %c0 = arith.constant 0 : index
    %c0_1 = arith.constant 0 : index
    %3 = vector.load %arg9[%c0, %c0_1] : memref<1x128xf32, #tpu.memory_space<vmem>>, vector<1x128xf32>
    %c0_2 = arith.constant 0 : index
    %c0_3 = arith.constant 0 : index
    %4 = vector.load %arg3[%c0_2, %c0_3] : memref<1x256xbf16, #tpu.memory_space<vmem>>, vector<1x256xbf16>
    %c0_4 = arith.constant 0 : index
    %c0_5 = arith.constant 0 : index
    %5 = vector.load %arg7[%c0_4, %c0_5] : memref<256x128xbf16, #tpu.memory_space<vmem>>, vector<256x128xbf16>
    %cst = arith.constant dense<0.000000e+00> : vector<1x128xf32>
    %6 = tpu.matmul %4, %5, %cst {dimension_numbers = #tpu.dot_dimension_numbers<[1], [0], [0], [1], [0, 0, 1, 1], [], []>} : vector<1x256xbf16>, vector<256x128xbf16>, vector<1x128xf32> -> vector<1x128xf32>
    %7 = arith.addf %3, %6 : vector<1x128xf32>
    %c0_6 = arith.constant 0 : index
    %c0_7 = arith.constant 0 : index
    %8 = vector.load %arg9[%c0_6, %c0_7] : memref<1x128xf32, #tpu.memory_space<vmem>>, vector<1x128xf32>
    tpu.vector_store %arg9[%c0_6, %c0_7], %7 {strides = array<i32>} : memref<1x128xf32, #tpu.memory_space<vmem>>, vector<1x128xf32>,
    %c0_i32_8 = arith.constant 0 : i32
    %9 = arith.cmpi eq, %arg1, %c0_i32_8 : i32
    %10 = arith.extui %9 : i1 to i32
    %c0_i32_9 = arith.constant 0 : i32
    %11 = arith.cmpi ne, %10, %c0_i32_9 : i32
    scf.if %11 {
      %c0_10 = arith.constant 0 : index
      %12 = memref.load %arg2[%c0_10] : memref<5xf32, #tpu.memory_space<smem>>
      %c1 = arith.constant 1 : index
      %13 = memref.load %arg2[%c1] : memref<5xf32, #tpu.memory_space<smem>>
      %c2 = arith.constant 2 : index
      %14 = memref.load %arg2[%c2] : memref<5xf32, #tpu.memory_space<smem>>
      %c3 = arith.constant 3 : index
      %15 = memref.load %arg2[%c3] : memref<5xf32, #tpu.memory_space<smem>>
      %c4 = arith.constant 4 : index
      %16 = memref.load %arg2[%c4] : memref<5xf32, #tpu.memory_space<smem>>
      %c0_11 = arith.constant 0 : index
      %c0_12 = arith.constant 0 : index
      %17 = vector.load %arg4[%c0_11, %c0_12] : memref<1x128xf32, #tpu.memory_space<vmem>>, vector<1x128xf32>
      %c0_13 = arith.constant 0 : index
      %c0_14 = arith.constant 0 : index
      %18 = vector.load %arg9[%c0_13, %c0_14] : memref<1x128xf32, #tpu.memory_space<vmem>>, vector<1x128xf32>
      %19 = arith.addf %17, %18 : vector<1x128xf32>
      %20 = vector.broadcast %16 : f32 to vector<1x128xf32>
      %21 = arith.addf %19, %20 : vector<1x128xf32>
      %cst_15 = arith.constant 0.000000e+00 : f32
      %22 = vector.broadcast %cst_15 : f32 to vector<1x128xf32>
      %23 = arith.maximumf %21, %22 : vector<1x128xf32>
      %24 = vector.broadcast %14 : f32 to vector<1x128xf32>
      %25 = arith.mulf %23, %24 : vector<1x128xf32>
      %c0_16 = arith.constant 0 : index
      %c0_17 = arith.constant 0 : index
      %26 = vector.load %arg5[%c0_16, %c0_17] : memref<1x128xf32, #tpu.memory_space<vmem>>, vector<1x128xf32>
      %27 = vector.broadcast %12 : f32 to vector<1x128xf32>
      %28 = arith.mulf %26, %27 : vector<1x128xf32>
      %29 = arith.addf %25, %28 : vector<1x128xf32>
      %c0_18 = arith.constant 0 : index
      %c0_19 = arith.constant 0 : index
      %30 = vector.load %arg6[%c0_18, %c0_19] : memref<1x128xf32, #tpu.memory_space<vmem>>, vector<1x128xf32>
      %31 = vector.broadcast %13 : f32 to vector<1x128xf32>
      %32 = arith.mulf %30, %31 : vector<1x128xf32>
      %33 = arith.addf %29, %32 : vector<1x128xf32>
      %34 = vector.broadcast %15 : f32 to vector<1x128xf32>
      %35 = arith.addf %33, %34 : vector<1x128xf32>
      %cst_20 = arith.constant 0.000000e+00 : f32
      %36 = vector.broadcast %cst_20 : f32 to vector<1x128xf32>
      %37 = arith.maximumf %35, %36 : vector<1x128xf32>
      %c0_21 = arith.constant 0 : index
      %c0_22 = arith.constant 0 : index
      %38 = vector.load %arg8[%c0_21, %c0_22] : memref<1x128xf32, #tpu.memory_space<vmem>>, vector<1x128xf32>
      tpu.vector_store %arg8[%c0_21, %c0_22], %37 {strides = array<i32>} : memref<1x128xf32, #tpu.memory_space<vmem>>, vector<1x128xf32>,
    } else {
    }
    return
  }
  func.func @transform_0(%arg0: i32, %arg1: i32) -> i32 {
    %c0_i32 = arith.constant 0 : i32
    %c0_i32_0 = arith.constant 0 : i32
    return %c0_i32 : i32
  }
  func.func @transform_1(%arg0: i32, %arg1: i32) -> (i32, i32) {
    %c0_i32 = arith.constant 0 : i32
    %c0_i32_0 = arith.constant 0 : i32
    return %c0_i32, %arg1 : i32, i32
  }
  func.func @transform_2(%arg0: i32, %arg1: i32) -> (i32, i32) {
    %c0_i32 = arith.constant 0 : i32
    %c0_i32_0 = arith.constant 0 : i32
    return %c0_i32, %arg0 : i32, i32
  }
  func.func @transform_3(%arg0: i32, %arg1: i32) -> (i32, i32) {
    %c0_i32 = arith.constant 0 : i32
    %c0_i32_0 = arith.constant 0 : i32
    return %c0_i32, %arg0 : i32, i32
  }
  func.func @transform_4(%arg0: i32, %arg1: i32) -> (i32, i32) {
    %c0_i32 = arith.constant 0 : i32
    %c0_i32_0 = arith.constant 0 : i32
    return %c0_i32, %arg0 : i32, i32
  }
  func.func @transform_5(%arg0: i32, %arg1: i32) -> (i32, i32) {
    %c0_i32 = arith.constant 0 : i32
    return %arg1, %arg0 : i32, i32
  }
  func.func @transform_6(%arg0: i32, %arg1: i32) -> (i32, i32) {
    %c0_i32 = arith.constant 0 : i32
    %c0_i32_0 = arith.constant 0 : i32
    return %c0_i32, %arg0 : i32, i32
  }
}

</mosaic_0001>

<bundles_post_ra>
// kernel: tpu_custom_call.1
= control target key start
LH: loop header
LB: loop body
LE: loop exit
PB: predicated region body
PF: predicated region fallthrough
CT: control target
= control target key end

     0   :  { %s1287_s0 = inlined_call_operand.hbm [shape: f32[5], index: 0, kind: input, shape index: {}]   ;;  %s1288_s1 = inlined_call_operand.vmem [shape: bf16[1,256], index: 1, kind: input, shape index: {}]   ;;  %s1289_s2 = inlined_call_operand.vmem [shape: f32[1,256], index: 2, kind: input, shape index: {}]   ;;  %s1290_s3 = inlined_call_operand.vmem [shape: f32[1,256], index: 3, kind: input, shape index: {}]   ;;  %s1291_s4 = inlined_call_operand.vmem [shape: f32[1,256], index: 4, kind: input, shape index: {}]   ;;  %s1292_s5 = inlined_call_operand.hbm [shape: bf16[256,256], index: 5, kind: input, shape index: {}]   ;;  %s1293_s6 = inlined_call_operand.hbm [shape: f32[1,256], index: 6, kind: output, shape index: {}]  }
   0x1   :  { %1300 = sst [smem:[#allocation13_spill]] %s1287_s0 }
   0x2   :  { %11 = vsyncpa [#allocation6], 0 }
   0x3   :  { %12 = vsyncpa [#allocation4], 0 }
   0x4   :  { %14 = vsyncpa [#allocation4 + $0x1], 0 }
   0x5   :  { %15 = vsyncpa [#allocation5], 0 }
   0x6   :  { %17 = vsyncpa [#allocation5 + $0x1], 0  ;;  %s1055_s21 = smov 0   ;;  %s1057_s22 = smov 0  }
   0x7   :  { %s1059_s23 = smov 0   ;;  %s1061_s24 = smov 0  }
   0x8   :  { %s1063_s25 = smov 0   ;;  %s1065_s26 = smov 0  }
   0x9 LB: > { %1301 = sst [smem:[#allocation12_spill]] %s1010_s26  ;;  %s730_s27 = sadd.s32 4294967295, %s1010_s26   ;;  %s1010_s26 = sphi %s1065_s26, %s23_s26   ;;  %s1006_s25 = sphi %s1063_s25, %s1320_s25   ;;  %s1002_s24 = sphi %s1061_s24, %s1319_s24   ;;  %s998_s23 = sphi %s1059_s23, %s1318_s23   ;;  %s994_s22 = sphi %s1057_s22, %s1317_s22   ;;  %s990_s21 = sphi %s1055_s21, %s1316_s21  }
   0xa   : > { %s731_s28 = sadd.s32 4294967294, %s1010_s26   ;;  %p176_p0 = scmp.ne.s32.totalorder %s998_s23, %s994_s22 }
   0xb   : > { %p177_p1 = scmp.eq.s32.totalorder %s1010_s26, 0  ;;  %p182_p2 = scmp.ne.s32.totalorder %s994_s22, %s990_s21 }
   0xc   : > { %p1093_p3 = scmp.eq.s32.totalorder %s730_s27, 0  ;;  %p206_p4 = scmp.eq.s32.totalorder %s730_s27, 1 }
   0xd   : > { %p178_p5 = por %p177_p1, %p176_p0  ;;  %p212_p6 = scmp.eq.s32.totalorder %s731_s28, 1 }
   0xe   : > { %s1302_s30 = scalar_select %p1093_p3, 1, 0 }
   0xf   : > { %p1099_p7 = por %p1093_p3, %p182_p2  ;;  %p1103_p8 = por %p206_p4, %p176_p0 }
  0x10   : > { %p1107_p9 = por %p212_p6, %p182_p2  ;;  %p732_p10 = scmp.ge.s32.totalorder %s1010_s26, 1 }
  0x11   : > { %s1303_s7 = scalar_select %p1099_p7, 1, 0 }
  0x12   : > { %s1304_s8 = scalar_select %p1103_p8, 1, 0 }
  0x13   : > { %s1305_s9 = scalar_select %p1107_p9, 1, 0 }
  0x14   : > { %p219_p11 = scmp.lt.s32.totalorder %s1010_s26, 3  ;;  %p808_p1 = scmp.lt.s32.totalorder %s1010_s26, 2 }
  0x15   : > { %s267_s11 = sand.u32 1, %s998_s23   ;;  %s35_s13 = sadd.s32 1, %s1006_s25 }
  0x16   : > { %p1114_p13 = pnand %p732_p10, %p219_p11  ;;  %p1122_p0 = pnand %p808_p1, %p178_p5 }
  0x17   : > { %s736_s14 = sshll.u32 %s267_s11, 7  ;;  %p37_p4 = scmp.ge.s32.totalorder %s35_s13, 2 }
  0x18   : > { %p795_p7 = pneg %p1114_p13  ;;  %s1308_s0 = sld [smem:[#allocation13_spill]] }
  0x1a   : > { %p796_p2 = pnand %p795_p7, %p1093_p3 }
  0x1c   : > { %p883_p10 = pneg %p796_p2 }
  0x1e   : > { %s881_s17 = scalar_lea.hbm %s1308_s0, 16 }
  0x1f   : > { %p882_p6 = scmp.ne.s32.totalorder %s1308_s0, %s881_s17  ;;  %p888_p5 = scmp.lt.u32.totalorder %s881_s17, %s1308_s0 }
  0x21   : > { %p884_p11 = pnand %p883_p10, %p882_p6 }
  0x23   : > { %p885_p12 = pneg %p884_p11 }
  0x25   : > { %p890_p1 = pnand %p888_p5, %p885_p12 }
  0x27   : > { %893 = shalt.err (!%p890_p1)
}
  0x28   : > { %s1012_s28 = smov [#allocation3]   ;;  %s1322_s13 = smov (%p37_p4, %s35_s13), 0 }
  0x29   : > { %798 = dma.hbm_to_smem (!%p796_p2), %s1308_s0, 16, %s1012_s28, [#allocation6]  }
  0x2a   : > { %s737_s15 = sshll.u32 %s1006_s25, 6  ;;  %s165_s16 = ssub.s32 %s1006_s25, %s1322_s13 }
  0x2b   : > { %s1149_s19 = scalar_lea.hbm %s1292_s5, %s737_s15  ;;  %p167_p7 = scmp.eq.s32.totalorder %s165_s16, 0 }
  0x2c   : > { %s271_s26 = scalar_lea.vmem [#allocation7], %s736_s14  ;;  %s1309_s20 = sadd.s32 1, %s998_s23 }
  0x2d   : > { %s280_s29 = sshll.u32 %s271_s26, 4  ;;  %s1158_s28 = scalar_lea.sflag [#allocation4], %s267_s11  ;;  %s1151_s29 = int_to_ptr.vmem [resolvable:$true] %s280_s29 }
  0x2e   : > { %s1156_s27 = scalar_select %p167_p7, %s998_s23, %s1309_s20  }
  0x2f   : > { %s894_s0 = scalar_lea.hbm %s1149_s19, 2048  ;;  %p896_p2 = pneg %p1122_p0 }
  0x30   : > { %p895_p12 = scmp.ne.s32.totalorder %s1149_s19, %s894_s0  ;;  %s899_s14 = scalar_lea.hbm %s1292_s5, 4096 }
  0x31   : > { %p900_p10 = scmp.lt.u32.totalorder %s1149_s19, %s1292_s5  ;;  %p901_p11 = scmp.lt.u32.totalorder %s899_s14, %s894_s0 }
  0x32   : > { %p897_p4 = pnand %p896_p2, %p895_p12  ;;  %p903_p1 = scmp.lt.u32.totalorder %s894_s0, %s1149_s19 }
  0x33   : > { %p902_p5 = por %p901_p11, %p900_p10 }
  0x34   : > { %p898_p6 = pneg %p897_p4 }
  0x35   : > { %p904_p7 = por %p903_p1, %p902_p5 }
  0x37   : > { %p905_p9 = pnand %p904_p7, %p898_p6 }
  0x39   : > { %908 = shalt.err (!%p905_p9)
}
  0x3a   : > { %s909_s11 = scalar_lea.vmem %s1151_s29, 2048  ;;  %s1013_s26 = smov [#allocation7]  }
  0x3b   : > { %p910_p12 = scmp.ne.s32.totalorder %s1151_s29, %s909_s11  ;;  %s914_s20 = sshll.u32 %s1013_s26, 4  ;;  %s915_s20 = int_to_ptr.vmem [resolvable:$false] %s914_s20 }
  0x3c   : > { %s916_s15 = scalar_lea.vmem %s915_s20, 4096  ;;  %p917_p3 = scmp.lt.s32.totalorder %s1151_s29, %s915_s20 }
  0x3d   : > { %p912_p4 = pnand %p910_p12, %p896_p2  ;;  %p918_p10 = scmp.lt.s32.totalorder %s916_s15, %s909_s11 }
  0x3f   : > { %p913_p8 = pneg %p912_p4  ;;  %p919_p11 = por %p918_p10, %p917_p3 }
  0x41   : > { %p920_p5 = pnand %p919_p11, %p913_p8 }
  0x43   : > { %923 = shalt.err (!%p920_p5)
}
  0x44   : > { %s1014_s0 = smov 128   ;;  %s1015_s18 = smov 64  }
  0x45   : > { %s1016_s14 = smov 4   ;;  %292 = sbr.rel (%p1114_p13) target bundleno = 371 (0x173), region = 44 }
  0x46   : > { %802 = dma.hbm_to_vmem [thread:$0]  (!%p1122_p0), %s1149_s19, 2048, %s1151_s29, %s1158_s28, %s1014_s0, %s1015_s18, %s1016_s14  }
  0x47   : > { %p1310_p9 = scmp.ne.s32.totalorder (!%p1114_p13), %s1302_s30, 0 }
  0x4c   : > { %977 = dma.done.wait (%p1310_p9), [#allocation6], 16  }
  0x4d   : > { %979 = vsyncadd (%p1310_p9), [#allocation6], 4294967280  ;;  %s1193_s16 = sand.u32 1, %s994_s22   ;;  %p1311_p3 = scmp.ne.s32.totalorder %s1303_s7, 0 }
  0x4e   : > { %s740_s17 = sshll.u32 %s1193_s16, 7  ;;  %s299_s11 = scalar_lea.sflag [#allocation4], %s1193_s16 }
  0x4f   : > { %s1197_s26 = scalar_lea.vmem [#allocation7], %s740_s17 }
  0x50   : > { %981 = dma.done.wait (%p1311_p3), %s299_s11, 2048  }
  0x51   : > { %983 = vsyncadd (%p1311_p3), %s299_s11, 4294965248 }
  0x52   : > { %307 = sfence }
  0x53   : > { %v865_v0 = vld [vmem:[%s1197_s26 + $0x40] sm:$0xff]   ;;  %v867_v2 = vld [vmem:[%s1197_s26 + $0x48] sm:$0xff]   ;;  %v869_v4 = vld [vmem:[%s1197_s26 + $0x50] sm:$0xff]   ;;  %v411_v9 = vlaneseq  ;;  %v1017_v13 = vmov 1966171168   ;;  %v1018_v26 = vmov 0.0  }
  0x54   : > { %v866_v1 = vld [vmem:[%s1197_s26] sm:$0xff]   ;;  %765 = vmatprep.subr.bf16.mxu0 %v865_v0  ;;  %v868_v3 = vld [vmem:[%s1197_s26 + $0x8] sm:$0xff]   ;;  %v870_v5 = vld [vmem:[%s1197_s26 + $0x10] sm:$0xff]   ;;  %v409_v14 = vunpack.c.l.s4 %v1017_v13  ;;  %364 = vst [vmem:[#allocation2] sm:$0x1] %v1018_v26  ;;  %p349_p8 = scmp.lt.s32.totalorder %s1002_s24, 1 }
  0x55   : > { %766 = vmatpush3.bf16.msra.mxu0 %v866_v1  ;;  %v871_v6 = vld [vmem:[%s1197_s26 + $0x58] sm:$0xff]   ;;  %v873_v8 = vld [vmem:[%s1197_s26 + $0x60] sm:$0xff]   ;;  %v875_v11 = vld [vmem:[%s1197_s26 + $0x68] sm:$0xff]   ;;  %v412_v15 = vshrl.u32 %v411_v9, 7  ;;  %s761_s12 = sld [smem:[#allocation3 + $0x4]]  ;;  %s565_s19 = sld [smem:[#allocation3]] }
  0x56   : > { %767 = vmatprep.subr.bf16.mxu0 %v867_v2  ;;  %v872_v7 = vld [vmem:[%s1197_s26 + $0x18] sm:$0xff]   ;;  %v874_v10 = vld [vmem:[%s1197_s26 + $0x20] sm:$0xff]   ;;  %v876_v16 = vld [vmem:[%s1197_s26 + $0x28] sm:$0xff]   ;;  %v410_v18 = vunpack.c.0.s8 %v409_v14  ;;  %s350_s10 = scalar_select %p349_p8, %s1002_s24, 1 }
  0x57   : > { %v741_v12 = vld.sshfl [vmem:[%s1288_s1] sm:$0x11 pattern:$0x75316420]  ;;  %v877_v19 = vld [vmem:[%s1197_s26 + $0x70] sm:$0xff]   ;;  %s758_s15 = sld [smem:[#allocation3 + $0x1]] }
  0x58   : > { %v407_v17 = vcombine.high %v741_v12, %v741_v12  ;;  %v413_v20 = vsub.s32 %v410_v18, %v412_v15  ;;  %v878_v21 = vld [vmem:[%s1197_s26 + $0x30] sm:$0xff]   ;;  %v879_v23 = vld [vmem:[%s1197_s26 + $0x78] sm:$0xff]   ;;  %s351_s20 = scalar_lea.vmem %s1289_s2, %s350_s10  ;;  %s759_s0 = sld [smem:[#allocation3 + $0x2]] }
  0x59   : > { %768 = vmatpush3.bf16.msra.mxu0 %v868_v3  ;;  %v880_v24 = vld [vmem:[%s1197_s26 + $0x38] sm:$0xff]   ;;  %s354_s17 = scalar_lea.vmem %s1290_s3, %s350_s10  ;;  %s357_s30 = scalar_lea.vmem %s1291_s4, %s350_s10 }
  0x5a   : > { %769 = vmatprep.subr.bf16.mxu0 %v869_v4  ;;  %v421_v22 = vrot.slane %v407_v17, %v413_v20  ;;  %v414_v25 = vrot.slane %v741_v12, %v413_v20  ;;  %v570_v34 = vld [vmem:[%s351_s20] sm:$0x1]  ;;  %s760_s7 = sld [smem:[#allocation3 + $0x3]]  ;;  %s762_s10 = sshll.u32 %s1002_s24, 4 }
  0x5b   : > { %v365_v28 = vld [vmem:[#allocation2] sm:$0x1]  ;;  %v573_v36 = vstv %s761_s12  ;;  %v579_v39 = vstv %s565_s19  ;;  %s343_s12 = scalar_lea.vmem [#allocation8], %s1193_s16  ;;  %s1238_s20 = scalar_lea.hbm %s1293_s6, %s762_s10 }
  0x5c   : > { %552 = vmatprep.mubr.bf16.mxu0 %v421_v22  ;;  %v578_v38 = vld [vmem:[%s354_s17] sm:$0x1]  ;;  %s603_s29 = sshll.u32 %s343_s12, 4  ;;  %p1312_p0 = scmp.ne.s32.totalorder %s1304_s8, 0  ;;  %s1240_s29 = int_to_ptr.vmem [resolvable:$true] %s603_s29 }
  0x5d   : > { %770 = vmatpush3.bf16.msra.mxu0 %v870_v5  ;;  %v582_v42 = vld [vmem:[%s357_s30] sm:$0x1]  ;;  %v583_v43 = vstv %s758_s15  ;;  %v580_v45 = vmul.f32 %v579_v39, %v578_v38  ;;  %s591_s15 = scalar_lea.sflag [#allocation5], %s1193_s16  ;;  %s1019_s24 = smov [#allocation8]  }
  0x5e   : > { %771 = vmatprep.subr.bf16.mxu0 %v871_v6  ;;  %v576_v41 = vstv %s759_s0  ;;  %v584_v47 = vmul.f32 %v583_v43, %v582_v42  ;;  %s924_s0 = scalar_lea.vmem %s1240_s29, 16  ;;  %s928_s18 = sshll.u32 %s1019_s24, 4  ;;  %s929_s18 = int_to_ptr.vmem [resolvable:$false] %s928_s18 }
  0x5f   : > { %p925_p13 = scmp.ne.s32.totalorder %s1240_s29, %s924_s0  ;;  %s930_s14 = scalar_lea.vmem %s929_s18, 32 }
  0x60   : > { %v586_v49 = vstv %s760_s7  ;;  %p931_p1 = scmp.lt.s32.totalorder %s1240_s29, %s929_s18  ;;  %p932_p7 = scmp.lt.s32.totalorder %s930_s14, %s924_s0 }
  0x61   : > { %772 = vmatpush3.bf16.msra.mxu0 %v872_v7  ;;  %p926_p2 = pnand %p925_p13, %p1312_p0 }
  0x62   : > { %773 = vmatprep.subr.bf16.mxu0 %v873_v8  ;;  %p933_p12 = por %p932_p7, %p931_p1 }
  0x63   : > { %p927_p6 = pneg %p926_p2 }
  0x65   : > { %774 = vmatpush3.bf16.msra.mxu0 %v874_v10  ;;  %p934_p4 = pnand %p933_p12, %p927_p6 }
  0x66   : > { %775 = vmatprep.subr.bf16.mxu0 %v875_v11 }
  0x69   : > { %776 = vmatpush3.bf16.msra.mxu0 %v876_v16 }
  0x6a   : > { %777 = vmatprep.subr.bf16.mxu0 %v877_v19 }
  0x6d   : > { %778 = vmatpush3.bf16.msra.mxu0 %v878_v21 }
  0x6e   : > { %779 = vmatprep.subr.bf16.mxu0 %v879_v23 }
  0x71   : > { %780 = vmatpush3.bf16.msra.mxu0 %v880_v24 }
  0x74   : > { %553 = vmatmul.mubr.bf16.vlgmr.msra.gmra.mrb[0].mxu0 %v414_v25 }
 0x147   : > { %v781_v27 = vpop.f32.mrb[0].mxu0 }
 0x148   : > { %v782_v29 = vpop.f32.mrb[1].mxu0 }
 0x149   : > { %v783_v30 = vadd.f32 %v782_v29, %v781_v27  ;;  %v784_v31 = vpop.f32.mrb[2].mxu0 }
 0x14a   : > { %v785_v32 = vpop.f32.mrb[3].mxu0 }
 0x14b   : > { %v560_v33 = vadd.f32 %v783_v30, %v365_v28 }
 0x14d   : > { %561 = vst [vmem:[#allocation2] sm:$0x1] %v560_v33 }
 0x154   : > { %v571_v35 = vld [vmem:[#allocation2] sm:$0x1] }
 0x155   : > { %v572_v37 = vadd.f32 %v571_v35, %v570_v34 }
 0x157   : > { %v574_v40 = vadd.f32 %v573_v36, %v572_v37 }
 0x159   : > { %v575_v44 = vmax.f32 %v574_v40, 0.0 }
 0x15b   : > { %v577_v46 = vmul.f32 %v576_v41, %v575_v44 }
 0x15d   : > { %v581_v48 = vadd.f32 %v580_v45, %v577_v46 }
 0x15f   : > { %v585_v50 = vadd.f32 %v584_v47, %v581_v48 }
 0x161   : > { %v587_v51 = vadd.f32 %v586_v49, %v585_v50 }
 0x163   : > { %v588_v52 = vmax.f32 %v587_v51, 0.0 }
 0x165   : > { %589 = vst [vmem:[%s343_s12] sm:$0x1] %v588_v52 }
 0x166   : > { %937 = shalt.err (!%p934_p4)
}
 0x167   : > { %s938_s16 = scalar_lea.hbm %s1238_s20, 16  ;;  %s942_s26 = scalar_lea.hbm %s1293_s6, 32 }
 0x168   : > { %p939_p10 = scmp.ne.s32.totalorder %s1238_s20, %s938_s16  ;;  %p943_p9 = scmp.lt.u32.totalorder %s1238_s20, %s1293_s6 }
 0x169   : > { %p944_p3 = scmp.lt.u32.totalorder %s942_s26, %s938_s16  ;;  %p946_p13 = scmp.lt.u32.totalorder %s938_s16, %s1238_s20 }
 0x16a   : > { %p940_p11 = pnand %p939_p10, %p1312_p0 }
 0x16b   : > { %p945_p8 = por %p944_p3, %p943_p9 }
 0x16c   : > { %p941_p5 = pneg %p940_p11 }
 0x16d   : > { %p947_p2 = por %p946_p13, %p945_p8 }
 0x16f   : > { %p948_p6 = pnand %p947_p2, %p941_p5 }
 0x171   : > { %951 = shalt.err (!%p948_p6)
}
 0x172   : > { %793 = dma.vmem_to_hbm [thread:$0]  (%p1312_p0), %s1240_s29, 16, %s1238_s20, %s591_s15  }
 0x173 PF: > { %s1313_s10 = sld [smem:[#allocation12_spill]]  ;;  %s615_s12 = sand.u32 1, %s990_s21  }
 0x174   : > { %p1314_p1 = scmp.ne.s32.totalorder %s1305_s9, 0  ;;  %s616_s28 = scalar_lea.sflag [#allocation5], %s615_s12 }
 0x179   : > { %p1315_p7 = scmp.ge.s32.totalorder %s1313_s10, 2 }
 0x17b   : > { %p804_p12 = pnand %p1315_p7, %p1314_p1 }
 0x17d   : > { %985 = dma.done.wait (!%p804_p12), %s616_s28, 16  }
 0x17e   : > { %987 = vsyncadd (!%p804_p12), %s616_s28, 4294967280  ;;  %s23_s26 = sadd.s32 1, %s1313_s10   ;;  %s1316_s21 = smov %s994_s22 }
 0x17f   : > { %p20_p4 = scmp.ge.s32.totalorder %s23_s26, 4   ;;  %s1317_s22 = smov %s998_s23 }
 0x180   : > { %s1318_s23 = smov %s1156_s27  ;;  %s1319_s24 = smov %s1006_s25 }
 0x181   : > { %s1320_s25 = smov %s1322_s13  ;;  %22 = sbr.rel (!%p20_p4) target bundleno = 9 (0x9), region = 114 }
 0x188   :  { %620 = vsyncpa [#allocation4], 1 }
 0x189   :  { %622 = vsyncpa [#allocation4 + $0x1], 1 }
 0x18a   :  { %623 = vsyncpa [#allocation5], 1 }
 0x18b   :  { %625 = vsyncpa [#allocation5 + $0x1], 1 }
 0x18c   :  { %626 = vsyncpa [#allocation6], 1 }
 0x18d   :  { %628 = vsyncpa [#allocation6 + $0x1], 1 }

</bundles_post_ra>
